<compile_context>
chip_gen: v6e
topology: v6e:2x2x1
jax: 0.10.0
libtpu: 0.0.40
codegen_flags: <defaults>
</compile_context>

<pallas_src>
import functools

import jax
import jax.numpy as jnp
import numpy as np
from jax.experimental import pallas as pl
from jax.experimental.pallas import tpu as pltpu


def _round_up(x, m):
    return (x + m - 1) // m * m


def _fold_bn(gamma, beta, mean, var, eps=1e-3):
    s = gamma / jnp.sqrt(var + eps)
    b = beta - mean * s
    return s[None, :], b[None, :]


def _mpm_kernel(ids_ref, inp_ref, w1_ref, b1_ref, w2_ref, b2_ref,
                out_ref, max_scr, sum_scr, *, c_col):
    i = pl.program_id(0)
    last = pl.num_programs(0) - 1

    @pl.when(i == 0)
    def _init():
        max_scr[...] = jnp.zeros_like(max_scr)
        sum_scr[...] = jnp.zeros_like(sum_scr)

    # ---- stage 1: Linear1 (BN scale pre-folded into w1) + bias + ReLU -------
    # b1 has 1.0 at column `c_col`, so x[:, c_col] == 1.0 -> free count column.
    x = jnp.maximum(
        jnp.dot(inp_ref[...], w1_ref[...], preferred_element_type=jnp.float32)
        + b1_ref[...], 0.0)                                   # [TN, C_pad]

    ids = ids_ref[...]                                        # [TN, 1] int32 (-1 = pad row)
    TN = x.shape[0]
    P_pad = max_scr.shape[0]

    # ---- stage 2a: per-pillar sum + count via one one-hot MXU matmul --------
    pid_row = jax.lax.broadcasted_iota(jnp.int32, (TN, P_pad), 1)
    onehot = (ids == pid_row).astype(jnp.float32)             # [TN, P_pad]
    sum_scr[...] += jax.lax.dot_general(
        onehot, x, (((0,), (0,)), ((), ())),
        preferred_element_type=jnp.float32)                   # [P_pad, C_pad]

    # ---- stage 2b: per-pillar max, 8 pillars per iteration -------------------
    # x >= 0 after ReLU, so 0.0 is a safe masked fill and a safe accumulator init.
    def grp(g, carry):
        base = pl.multiple_of(g * 8, 8)
        rows = [jnp.max(jnp.where(ids == (base + j), x, 0.0),
                        axis=0, keepdims=True) for j in range(8)]
        tile = jnp.concatenate(rows, axis=0)                  # [8, C_pad]
        cur = max_scr[pl.ds(base, 8), :]
        max_scr[pl.ds(base, 8), :] = jnp.maximum(cur, tile)
        return carry

    jax.lax.fori_loop(0, P_pad // 8, grp, 0)

    # ---- stage 3 (last block): mean, cat(max|mean), Linear2 + bias + ReLU ----
    @pl.when(i == last)
    def _finish():
        sums = sum_scr[...]
        cnt = sums[:, c_col:c_col + 1]                        # [P_pad, 1]
        inv = pl.reciprocal(jnp.maximum(cnt, 1.0), approx=True)
        mean = sums * inv
        cat = jnp.concatenate([max_scr[...], mean], axis=1)   # [P_pad, 2*C_pad]
        h2 = jnp.dot(cat, w2_ref[...], preferred_element_type=jnp.float32)
        out_ref[...] = jnp.maximum(h2 + b2_ref[...], 0.0)


def max_plus_mean_forward(inputs, unq_inv, num_pillars, params, block_n=512):
    N, Cin = inputs.shape
    C = params["w1"].shape[1]

    C_pad = _round_up(C + 1, 128)       # +1 lane reserved for the count column
    c_col = C
    P_pad = _round_up(num_pillars, 8)
    N_pad = _round_up(N, block_n)

    s1, b1 = _fold_bn(params["g1"], params["be1"], params["rm1"], params["rv1"])
    s2, b2 = _fold_bn(params["g2"], params["be2"], params["rm2"], params["rv2"])

    # Fold BN scale into Linear1 weights, pad channels to C_pad.
    w1_pad = jnp.zeros((Cin, C_pad), jnp.float32).at[:, :C].set(params["w1"] * s1)
    b1_pad = jnp.zeros((1, C_pad), jnp.float32).at[0, :C].set(b1[0])
    b1_pad = b1_pad.at[0, c_col].set(1.0)      # makes the count column equal 1.0

    # channel_shuffle(groups=2) + BN scale folded into Linear2 weights.
    #   shuffled[:, 2c+g] = cat[:, g*C + c]  =>  w2_eff[m, :] = w2t[2*(m % C) + m // C, :]
    m = jnp.arange(2 * C)
    inv_perm = 2 * (m % C) + (m // C)
    w2_eff = params["w2t"][inv_perm, :] * s2                  # [2C, C]
    w2_pad = jnp.zeros((2 * C_pad, C_pad), jnp.float32)
    w2_pad = w2_pad.at[:C, :C].set(w2_eff[:C])                # max half
    w2_pad = w2_pad.at[C_pad:C_pad + C, :C].set(w2_eff[C:])   # mean half
    b2_pad = jnp.zeros((1, C_pad), jnp.float32).at[0, :C].set(b2[0])

    # Pad points; padded rows get pillar id -1 (never matches any pillar).
    inp_pad = jnp.zeros((N_pad, Cin), jnp.float32).at[:N].set(inputs.astype(jnp.float32))
    ids_pad = jnp.full((N_pad, 1), -1, jnp.int32).at[:N, 0].set(unq_inv.astype(jnp.int32))

    kernel = functools.partial(_mpm_kernel, c_col=c_col)

    out = pl.pallas_call(
        kernel,
        out_shape=jax.ShapeDtypeStruct((P_pad, C_pad), jnp.float32),
        grid_spec=pltpu.PrefetchScalarGridSpec(
            num_scalar_prefetch=0,
            grid=(N_pad // block_n,),
            in_specs=[
                pl.BlockSpec((block_n, 1), lambda i: (i, 0)),        # pillar ids
                pl.BlockSpec((block_n, Cin), lambda i: (i, 0)),      # points
                pl.BlockSpec((Cin, C_pad), lambda i: (0, 0)),        # w1 (resident)
                pl.BlockSpec((1, C_pad), lambda i: (0, 0)),          # b1
                pl.BlockSpec((2 * C_pad, C_pad), lambda i: (0, 0)),  # w2 (resident)
                pl.BlockSpec((1, C_pad), lambda i: (0, 0)),          # b2
            ],
            out_specs=pl.BlockSpec((P_pad, C_pad), lambda i: (0, 0)),
            scratch_shapes=[pltpu.VMEM((P_pad, C_pad), jnp.float32),   # running max
                            pltpu.VMEM((P_pad, C_pad), jnp.float32)],  # running sum+cnt
        ),
        compiler_params=pltpu.CompilerParams(
            dimension_semantics=("arbitrary",),
            vmem_limit_bytes=32 * 1024 * 1024),
    )(ids_pad, inp_pad, w1_pad, b1_pad, w2_pad, b2_pad)

    return out[:num_pillars, :C]


def ref_forward(inputs, unq_inv, num_pillars, params):
    """Pure-JAX reference matching the PyTorch module (eval-mode BN)."""
    C = params["w1"].shape[1]
    s1, b1 = _fold_bn(params["g1"], params["be1"], params["rm1"], params["rv1"])
    s2, b2 = _fold_bn(params["g2"], params["be2"], params["rm2"], params["rv2"])
    x = jnp.maximum(inputs @ params["w1"] * s1 + b1, 0.0)
    x_max = jax.ops.segment_max(x, unq_inv, num_segments=num_pillars)
    x_sum = jax.ops.segment_sum(x, unq_inv, num_segments=num_pillars)
    cnt = jax.ops.segment_sum(jnp.ones((x.shape[0],)), unq_inv, num_segments=num_pillars)
    mean = x_sum / jnp.maximum(cnt, 1.0)[:, None]
    cat = jnp.concatenate([x_max, mean], axis=1)
    shuffled = cat.reshape(num_pillars, 2, C).transpose(0, 2, 1).reshape(num_pillars, 2 * C)
    return jnp.maximum(shuffled @ params["w2t"] * s2 + b2, 0.0)


if __name__ == "__main__":
    N, Cin, C, P = 64, 10, 32, 8   # points, in_channels, out_channels, pillars

    key = jax.random.PRNGKey(0)
    ks = jax.random.split(key, 12)

    params = dict(
        w1=jax.random.normal(ks[0], (Cin, C), jnp.float32) * 0.1,        # Linear1.weight.T
        g1=jax.random.uniform(ks[1], (C,), jnp.float32, 0.5, 1.5),
        be1=jax.random.normal(ks[2], (C,), jnp.float32) * 0.1,
        rm1=jax.random.normal(ks[3], (C,), jnp.float32) * 0.1,
        rv1=jax.random.uniform(ks[4], (C,), jnp.float32, 0.5, 1.5),
        w2t=jax.random.normal(ks[5], (2 * C, C), jnp.float32) * 0.1,     # Linear2.weight.T
        g2=jax.random.uniform(ks[6], (C,), jnp.float32, 0.5, 1.5),
        be2=jax.random.normal(ks[7], (C,), jnp.float32) * 0.1,
        rm2=jax.random.normal(ks[8], (C,), jnp.float32) * 0.1,
        rv2=jax.random.uniform(ks[9], (C,), jnp.float32, 0.5, 1.5),
    )

    inputs = jax.random.normal(ks[10], (N, Cin), jnp.float32)
    # unq_inv comes from torch.unique(..., return_inverse=True) upstream, so every
    # pillar index in [0, P) is guaranteed to appear at least once.
    unq_inv = jax.random.permutation(ks[11], jnp.arange(N, dtype=jnp.int32) % P)

    # block_n=32 -> grid of 2 point blocks, exercising the persistent accumulators.
    out = max_plus_mean_forward(inputs, unq_inv, P, params, block_n=32)
    out = jax.block_until_ready(out)

    ref = ref_forward(inputs, unq_inv, P, params)
    np.testing.assert_allclose(np.asarray(out), np.asarray(ref), rtol=2e-2, atol=2e-2)

    print("KERNEL_OK")
</pallas_src>

<mosaic_0001>
module attributes {stable_mosaic.version = 11 : i64} {
  func.func @_mpm_kernel(%arg0: i32, %arg1: memref<32x1xi32, #tpu.memory_space<vmem>>, %arg2: memref<32x10xf32, #tpu.memory_space<vmem>>, %arg3: memref<10x128xf32, #tpu.memory_space<vmem>>, %arg4: memref<1x128xf32, #tpu.memory_space<vmem>>, %arg5: memref<256x128xf32, #tpu.memory_space<vmem>>, %arg6: memref<1x128xf32, #tpu.memory_space<vmem>>, %arg7: memref<8x128xf32, #tpu.memory_space<vmem>>, %arg8: memref<8x128xf32, #tpu.memory_space<vmem>>, %arg9: memref<8x128xf32, #tpu.memory_space<vmem>>) attributes {dimension_semantics = [#tpu.dimension_semantics<arbitrary>], iteration_bounds = array<i64: 2>, scalar_prefetch = 0 : i64, scratch_operands = 2 : i64, tpu.core_type = #tpu.core_type<tc>, window_params = [{transform_indices = @transform_0, window_bounds = array<i64: 32, 1>}, {transform_indices = @transform_1, window_bounds = array<i64: 32, 10>}, {pipeline_mode = #tpu.pipeline_mode<synchronous>, transform_indices = @transform_2, window_bounds = array<i64: 10, 128>}, {pipeline_mode = #tpu.pipeline_mode<synchronous>, transform_indices = @transform_3, window_bounds = array<i64: 1, 128>}, {pipeline_mode = #tpu.pipeline_mode<synchronous>, transform_indices = @transform_4, window_bounds = array<i64: 256, 128>}, {pipeline_mode = #tpu.pipeline_mode<synchronous>, transform_indices = @transform_5, window_bounds = array<i64: 1, 128>}, {pipeline_mode = #tpu.pipeline_mode<synchronous>, transform_indices = @transform_6, window_bounds = array<i64: 8, 128>}]} {
    %c0_i32 = arith.constant 0 : i32
    %0 = arith.cmpi eq, %arg0, %c0_i32 : i32
    %1 = arith.extui %0 : i1 to i32
    %c0_i32_0 = arith.constant 0 : i32
    %2 = arith.cmpi ne, %1, %c0_i32_0 : i32
    scf.if %2 {
      %cst_37 = arith.constant 0.000000e+00 : f32
      %104 = vector.broadcast %cst_37 : f32 to vector<8x128xf32>
      %c0_38 = arith.constant 0 : index
      %c0_39 = arith.constant 0 : index
      %105 = vector.load %arg8[%c0_38, %c0_39] : memref<8x128xf32, #tpu.memory_space<vmem>>, vector<8x128xf32>
      tpu.vector_store %arg8[%c0_38, %c0_39], %104 {strides = array<i32>} : memref<8x128xf32, #tpu.memory_space<vmem>>, vector<8x128xf32>,
      %cst_40 = arith.constant 0.000000e+00 : f32
      %106 = vector.broadcast %cst_40 : f32 to vector<8x128xf32>
      %c0_41 = arith.constant 0 : index
      %c0_42 = arith.constant 0 : index
      %107 = vector.load %arg9[%c0_41, %c0_42] : memref<8x128xf32, #tpu.memory_space<vmem>>, vector<8x128xf32>
      tpu.vector_store %arg9[%c0_41, %c0_42], %106 {strides = array<i32>} : memref<8x128xf32, #tpu.memory_space<vmem>>, vector<8x128xf32>,
    } else {
    }
    %c0 = arith.constant 0 : index
    %c0_1 = arith.constant 0 : index
    %3 = vector.load %arg2[%c0, %c0_1] : memref<32x10xf32, #tpu.memory_space<vmem>>, vector<32x10xf32>
    %c0_2 = arith.constant 0 : index
    %c0_3 = arith.constant 0 : index
    %4 = vector.load %arg3[%c0_2, %c0_3] : memref<10x128xf32, #tpu.memory_space<vmem>>, vector<10x128xf32>
    %cst = arith.constant dense<0.000000e+00> : vector<32x128xf32>
    %5 = tpu.matmul %3, %4, %cst {dimension_numbers = #tpu.dot_dimension_numbers<[1], [0], [0], [1], [0, 0, 1, 1], [], []>} : vector<32x10xf32>, vector<10x128xf32>, vector<32x128xf32> -> vector<32x128xf32>
    %c0_4 = arith.constant 0 : index
    %c0_5 = arith.constant 0 : index
    %6 = vector.load %arg4[%c0_4, %c0_5] : memref<1x128xf32, #tpu.memory_space<vmem>>, vector<1x128xf32>
    %7 = vector.broadcast %6 : vector<1x128xf32> to vector<32x128xf32>
    %8 = arith.addf %5, %7 : vector<32x128xf32>
    %cst_6 = arith.constant 0.000000e+00 : f32
    %9 = vector.broadcast %cst_6 : f32 to vector<32x128xf32>
    %10 = arith.maximumf %8, %9 : vector<32x128xf32>
    %c0_7 = arith.constant 0 : index
    %c0_8 = arith.constant 0 : index
    %11 = vector.load %arg1[%c0_7, %c0_8] : memref<32x1xi32, #tpu.memory_space<vmem>>, vector<32x1xi32>
    %12 = tpu.iota {dimensions = array<i32: 1>} : vector<32x8xi32>
    %13 = vector.broadcast %11 : vector<32x1xi32> to vector<32x8xi32>
    %14 = arith.cmpi eq, %13, %12 : vector<32x8xi32>
    %15 = arith.extui %14 : vector<32x8xi1> to vector<32x8xi32>
    %16 = arith.sitofp %15 : vector<32x8xi32> to vector<32x8xf32>
    %c0_9 = arith.constant 0 : index
    %c0_10 = arith.constant 0 : index
    %17 = vector.load %arg9[%c0_9, %c0_10] : memref<8x128xf32, #tpu.memory_space<vmem>>, vector<8x128xf32>
    %cst_11 = arith.constant dense<0.000000e+00> : vector<8x128xf32>
    %18 = tpu.matmul %16, %10, %cst_11 {dimension_numbers = #tpu.dot_dimension_numbers<[0], [0], [1], [1], [0, 1, 1, 1], [], []>} : vector<32x8xf32>, vector<32x128xf32>, vector<8x128xf32> -> vector<8x128xf32>
    %19 = arith.addf %17, %18 : vector<8x128xf32>
    %c0_12 = arith.constant 0 : index
    %c0_13 = arith.constant 0 : index
    %20 = vector.load %arg9[%c0_12, %c0_13] : memref<8x128xf32, #tpu.memory_space<vmem>>, vector<8x128xf32>
    tpu.vector_store %arg9[%c0_12, %c0_13], %19 {strides = array<i32>} : memref<8x128xf32, #tpu.memory_space<vmem>>, vector<8x128xf32>,
    %c0_i32_14 = arith.constant 0 : i32
    %c8_i32 = arith.constant 8 : i32
    %21 = arith.muli %c0_i32_14, %c8_i32 : i32
    %22 = tpu.assume_multiple %21, 8 : i32
    %c0_i32_15 = arith.constant 0 : i32
    %23 = arith.addi %22, %c0_i32_15 : i32
    %24 = vector.broadcast %23 : i32 to vector<32x1xi32>
    %25 = arith.cmpi eq, %11, %24 : vector<32x1xi32>
    %cst_16 = arith.constant 0.000000e+00 : f32
    %26 = vector.shape_cast %25 : vector<32x1xi1> to vector<32x1xi1>
    %27 = vector.broadcast %26 : vector<32x1xi1> to vector<32x128xi1>
    %28 = vector.broadcast %cst_16 : f32 to vector<32x128xf32>
    %29 = arith.select %27, %10, %28 : vector<32x128xi1>, vector<32x128xf32>
    %cst_17 = arith.constant dense<0xFF800000> : vector<128xf32>
    %30 = vector.multi_reduction <maximumf>, %29, %cst_17 [0] : vector<32x128xf32> to vector<128xf32>
    %31 = vector.shape_cast %30 : vector<128xf32> to vector<1x128xf32>
    %c1_i32 = arith.constant 1 : i32
    %32 = arith.addi %22, %c1_i32 : i32
    %33 = vector.broadcast %32 : i32 to vector<32x1xi32>
    %34 = arith.cmpi eq, %11, %33 : vector<32x1xi32>
    %cst_18 = arith.constant 0.000000e+00 : f32
    %35 = vector.shape_cast %34 : vector<32x1xi1> to vector<32x1xi1>
    %36 = vector.broadcast %35 : vector<32x1xi1> to vector<32x128xi1>
    %37 = vector.broadcast %cst_18 : f32 to vector<32x128xf32>
    %38 = arith.select %36, %10, %37 : vector<32x128xi1>, vector<32x128xf32>
    %cst_19 = arith.constant dense<0xFF800000> : vector<128xf32>
    %39 = vector.multi_reduction <maximumf>, %38, %cst_19 [0] : vector<32x128xf32> to vector<128xf32>
    %40 = vector.shape_cast %39 : vector<128xf32> to vector<1x128xf32>
    %c2_i32 = arith.constant 2 : i32
    %41 = arith.addi %22, %c2_i32 : i32
    %42 = vector.broadcast %41 : i32 to vector<32x1xi32>
    %43 = arith.cmpi eq, %11, %42 : vector<32x1xi32>
    %cst_20 = arith.constant 0.000000e+00 : f32
    %44 = vector.shape_cast %43 : vector<32x1xi1> to vector<32x1xi1>
    %45 = vector.broadcast %44 : vector<32x1xi1> to vector<32x128xi1>
    %46 = vector.broadcast %cst_20 : f32 to vector<32x128xf32>
    %47 = arith.select %45, %10, %46 : vector<32x128xi1>, vector<32x128xf32>
    %cst_21 = arith.constant dense<0xFF800000> : vector<128xf32>
    %48 = vector.multi_reduction <maximumf>, %47, %cst_21 [0] : vector<32x128xf32> to vector<128xf32>
    %49 = vector.shape_cast %48 : vector<128xf32> to vector<1x128xf32>
    %c3_i32 = arith.constant 3 : i32
    %50 = arith.addi %22, %c3_i32 : i32
    %51 = vector.broadcast %50 : i32 to vector<32x1xi32>
    %52 = arith.cmpi eq, %11, %51 : vector<32x1xi32>
    %cst_22 = arith.constant 0.000000e+00 : f32
    %53 = vector.shape_cast %52 : vector<32x1xi1> to vector<32x1xi1>
    %54 = vector.broadcast %53 : vector<32x1xi1> to vector<32x128xi1>
    %55 = vector.broadcast %cst_22 : f32 to vector<32x128xf32>
    %56 = arith.select %54, %10, %55 : vector<32x128xi1>, vector<32x128xf32>
    %cst_23 = arith.constant dense<0xFF800000> : vector<128xf32>
    %57 = vector.multi_reduction <maximumf>, %56, %cst_23 [0] : vector<32x128xf32> to vector<128xf32>
    %58 = vector.shape_cast %57 : vector<128xf32> to vector<1x128xf32>
    %c4_i32 = arith.constant 4 : i32
    %59 = arith.addi %22, %c4_i32 : i32
    %60 = vector.broadcast %59 : i32 to vector<32x1xi32>
    %61 = arith.cmpi eq, %11, %60 : vector<32x1xi32>
    %cst_24 = arith.constant 0.000000e+00 : f32
    %62 = vector.shape_cast %61 : vector<32x1xi1> to vector<32x1xi1>
    %63 = vector.broadcast %62 : vector<32x1xi1> to vector<32x128xi1>
    %64 = vector.broadcast %cst_24 : f32 to vector<32x128xf32>
    %65 = arith.select %63, %10, %64 : vector<32x128xi1>, vector<32x128xf32>
    %cst_25 = arith.constant dense<0xFF800000> : vector<128xf32>
    %66 = vector.multi_reduction <maximumf>, %65, %cst_25 [0] : vector<32x128xf32> to vector<128xf32>
    %67 = vector.shape_cast %66 : vector<128xf32> to vector<1x128xf32>
    %c5_i32 = arith.constant 5 : i32
    %68 = arith.addi %22, %c5_i32 : i32
    %69 = vector.broadcast %68 : i32 to vector<32x1xi32>
    %70 = arith.cmpi eq, %11, %69 : vector<32x1xi32>
    %cst_26 = arith.constant 0.000000e+00 : f32
    %71 = vector.shape_cast %70 : vector<32x1xi1> to vector<32x1xi1>
    %72 = vector.broadcast %71 : vector<32x1xi1> to vector<32x128xi1>
    %73 = vector.broadcast %cst_26 : f32 to vector<32x128xf32>
    %74 = arith.select %72, %10, %73 : vector<32x128xi1>, vector<32x128xf32>
    %cst_27 = arith.constant dense<0xFF800000> : vector<128xf32>
    %75 = vector.multi_reduction <maximumf>, %74, %cst_27 [0] : vector<32x128xf32> to vector<128xf32>
    %76 = vector.shape_cast %75 : vector<128xf32> to vector<1x128xf32>
    %c6_i32 = arith.constant 6 : i32
    %77 = arith.addi %22, %c6_i32 : i32
    %78 = vector.broadcast %77 : i32 to vector<32x1xi32>
    %79 = arith.cmpi eq, %11, %78 : vector<32x1xi32>
    %cst_28 = arith.constant 0.000000e+00 : f32
    %80 = vector.shape_cast %79 : vector<32x1xi1> to vector<32x1xi1>
    %81 = vector.broadcast %80 : vector<32x1xi1> to vector<32x128xi1>
    %82 = vector.broadcast %cst_28 : f32 to vector<32x128xf32>
    %83 = arith.select %81, %10, %82 : vector<32x128xi1>, vector<32x128xf32>
    %cst_29 = arith.constant dense<0xFF800000> : vector<128xf32>
    %84 = vector.multi_reduction <maximumf>, %83, %cst_29 [0] : vector<32x128xf32> to vector<128xf32>
    %85 = vector.shape_cast %84 : vector<128xf32> to vector<1x128xf32>
    %c7_i32 = arith.constant 7 : i32
    %86 = arith.addi %22, %c7_i32 : i32
    %87 = vector.broadcast %86 : i32 to vector<32x1xi32>
    %88 = arith.cmpi eq, %11, %87 : vector<32x1xi32>
    %cst_30 = arith.constant 0.000000e+00 : f32
    %89 = vector.shape_cast %88 : vector<32x1xi1> to vector<32x1xi1>
    %90 = vector.broadcast %89 : vector<32x1xi1> to vector<32x128xi1>
    %91 = vector.broadcast %cst_30 : f32 to vector<32x128xf32>
    %92 = arith.select %90, %10, %91 : vector<32x128xi1>, vector<32x128xf32>
    %cst_31 = arith.constant dense<0xFF800000> : vector<128xf32>
    %93 = vector.multi_reduction <maximumf>, %92, %cst_31 [0] : vector<32x128xf32> to vector<128xf32>
    %94 = vector.shape_cast %93 : vector<128xf32> to vector<1x128xf32>
    %95 = tpu.concatenate %31, %40, %49, %58, %67, %76, %85, %94 in 0 : vector<1x128xf32>, vector<1x128xf32>, vector<1x128xf32>, vector<1x128xf32>, vector<1x128xf32>, vector<1x128xf32>, vector<1x128xf32>, vector<1x128xf32> -> vector<8x128xf32>
    %96 = arith.index_cast %22 : i32 to index
    %c0_32 = arith.constant 0 : index
    %97 = vector.load %arg8[%96, %c0_32] : memref<8x128xf32, #tpu.memory_space<vmem>>, vector<8x128xf32>
    %98 = arith.maximumf %97, %95 : vector<8x128xf32>
    %99 = arith.index_cast %22 : i32 to index
    %c0_33 = arith.constant 0 : index
    %100 = vector.load %arg8[%99, %c0_33] : memref<8x128xf32, #tpu.memory_space<vmem>>, vector<8x128xf32>
    tpu.vector_store %arg8[%99, %c0_33], %98 {strides = array<i32>} : memref<8x128xf32, #tpu.memory_space<vmem>>, vector<8x128xf32>,
    %c1_i32_34 = arith.constant 1 : i32
    %c1_i32_35 = arith.constant 1 : i32
    %101 = arith.cmpi eq, %arg0, %c1_i32_35 : i32
    %102 = arith.extui %101 : i1 to i32
    %c0_i32_36 = arith.constant 0 : i32
    %103 = arith.cmpi ne, %102, %c0_i32_36 : i32
    scf.if %103 {
      %c0_37 = arith.constant 0 : index
      %c0_38 = arith.constant 0 : index
      %104 = vector.load %arg9[%c0_37, %c0_38] : memref<8x128xf32, #tpu.memory_space<vmem>>, vector<8x128xf32>
      %105 = vector.extract_strided_slice %104 {offsets = [0, 32], sizes = [8, 1], strides = [1, 1]} : vector<8x128xf32> to vector<8x1xf32>
      %cst_39 = arith.constant 1.000000e+00 : f32
      %106 = vector.broadcast %cst_39 : f32 to vector<8x1xf32>
      %107 = arith.maximumf %105, %106 : vector<8x1xf32>
      %108 = tpu.reciprocal %107 {approx = true} : vector<8x1xf32> -> vector<8x1xf32>
      %109 = vector.broadcast %108 : vector<8x1xf32> to vector<8x128xf32>
      %110 = arith.mulf %104, %109 : vector<8x128xf32>
      %c0_40 = arith.constant 0 : index
      %c0_41 = arith.constant 0 : index
      %111 = vector.load %arg8[%c0_40, %c0_41] : memref<8x128xf32, #tpu.memory_space<vmem>>, vector<8x128xf32>
      %112 = tpu.concatenate %111, %110 in 1 : vector<8x128xf32>, vector<8x128xf32> -> vector<8x256xf32>
      %c0_42 = arith.constant 0 : index
      %c0_43 = arith.constant 0 : index
      %113 = vector.load %arg5[%c0_42, %c0_43] : memref<256x128xf32, #tpu.memory_space<vmem>>, vector<256x128xf32>
      %cst_44 = arith.constant dense<0.000000e+00> : vector<8x128xf32>
      %114 = tpu.matmul %112, %113, %cst_44 {dimension_numbers = #tpu.dot_dimension_numbers<[1], [0], [0], [1], [0, 0, 1, 1], [], []>} : vector<8x256xf32>, vector<256x128xf32>, vector<8x128xf32> -> vector<8x128xf32>
      %c0_45 = arith.constant 0 : index
      %c0_46 = arith.constant 0 : index
      %115 = vector.load %arg6[%c0_45, %c0_46] : memref<1x128xf32, #tpu.memory_space<vmem>>, vector<1x128xf32>
      %116 = vector.broadcast %115 : vector<1x128xf32> to vector<8x128xf32>
      %117 = arith.addf %114, %116 : vector<8x128xf32>
      %cst_47 = arith.constant 0.000000e+00 : f32
      %118 = vector.broadcast %cst_47 : f32 to vector<8x128xf32>
      %119 = arith.maximumf %117, %118 : vector<8x128xf32>
      %c0_48 = arith.constant 0 : index
      %c0_49 = arith.constant 0 : index
      %120 = vector.load %arg7[%c0_48, %c0_49] : memref<8x128xf32, #tpu.memory_space<vmem>>, vector<8x128xf32>
      tpu.vector_store %arg7[%c0_48, %c0_49], %119 {strides = array<i32>} : memref<8x128xf32, #tpu.memory_space<vmem>>, vector<8x128xf32>,
    } else {
    }
    return
  }
  func.func @transform_0(%arg0: i32) -> (i32, i32) {
    %c0_i32 = arith.constant 0 : i32
    %c0_i32_0 = arith.constant 0 : i32
    return %arg0, %c0_i32 : i32, i32
  }
  func.func @transform_1(%arg0: i32) -> (i32, i32) {
    %c0_i32 = arith.constant 0 : i32
    %c0_i32_0 = arith.constant 0 : i32
    return %arg0, %c0_i32 : i32, i32
  }
  func.func @transform_2(%arg0: i32) -> (i32, i32) {
    %c0_i32 = arith.constant 0 : i32
    %c0_i32_0 = arith.constant 0 : i32
    %c0_i32_1 = arith.constant 0 : i32
    return %c0_i32, %c0_i32_0 : i32, i32
  }
  func.func @transform_3(%arg0: i32) -> (i32, i32) {
    %c0_i32 = arith.constant 0 : i32
    %c0_i32_0 = arith.constant 0 : i32
    %c0_i32_1 = arith.constant 0 : i32
    return %c0_i32, %c0_i32_0 : i32, i32
  }
  func.func @transform_4(%arg0: i32) -> (i32, i32) {
    %c0_i32 = arith.constant 0 : i32
    %c0_i32_0 = arith.constant 0 : i32
    %c0_i32_1 = arith.constant 0 : i32
    return %c0_i32, %c0_i32_0 : i32, i32
  }
  func.func @transform_5(%arg0: i32) -> (i32, i32) {
    %c0_i32 = arith.constant 0 : i32
    %c0_i32_0 = arith.constant 0 : i32
    %c0_i32_1 = arith.constant 0 : i32
    return %c0_i32, %c0_i32_0 : i32, i32
  }
  func.func @transform_6(%arg0: i32) -> (i32, i32) {
    %c0_i32 = arith.constant 0 : i32
    %c0_i32_0 = arith.constant 0 : i32
    %c0_i32_1 = arith.constant 0 : i32
    return %c0_i32, %c0_i32_0 : i32, i32
  }
}

</mosaic_0001>

<bundles_post_ra>
// kernel: tpu_custom_call.1
= control target key start
LH: loop header
LB: loop body
LE: loop exit
PB: predicated region body
PF: predicated region fallthrough
CT: control target
= control target key end

     0   :  { %11 = vsyncpa [#allocation5], 0  ;;  %s1523_s0 = inlined_call_operand.vmem [shape: s32[64,1], index: 0, kind: input, shape index: {}]   ;;  %s1524_s1 = inlined_call_operand.vmem [shape: f32[64,10], index: 1, kind: input, shape index: {}]   ;;  %s1525_s2 = inlined_call_operand.vmem [shape: f32[10,128], index: 2, kind: input, shape index: {}]   ;;  %s1526_s3 = inlined_call_operand.vmem [shape: f32[1,128], index: 3, kind: input, shape index: {}]   ;;  %s1527_s4 = inlined_call_operand.hbm [shape: f32[256,128], index: 4, kind: input, shape index: {}]   ;;  %s1528_s5 = inlined_call_operand.vmem [shape: f32[1,128], index: 5, kind: input, shape index: {}]   ;;  %s1529_s6 = inlined_call_operand.hbm [shape: f32[8,128], index: 6, kind: output, shape index: {}]  }
   0x1   :  { %12 = vsyncpa [#allocation6], 0  ;;  %s1306_s21 = smov 0  }
   0x2 LB: > { %s1312_s22 = sadd.s32 4294967295, %s1260_s21   ;;  %p1064_p0 = scmp.ge.s32.totalorder %s1260_s21, 1  ;;  %s1260_s21 = sphi %s1306_s21, %s18_s21  }
   0x3   : > { %p180_p1 = scmp.lt.s32.totalorder %s1260_s21, 3  ;;  %s1262_s23 = smov [#allocation4]  }
   0x4   : > { %s198_s24 = sshll.u32 %s1262_s23, 4  ;;  %p1170_p4 = scmp.eq.s32.totalorder %s1312_s22, 0  ;;  %s199_s24 = int_to_ptr.vmem [resolvable:$true] %s198_s24 }
   0x5   : > { %p1317_p3 = pnand %p1064_p0, %p180_p1  ;;  %s1207_s26 = scalar_lea.vmem %s199_s24, 4096 }
   0x6   : > { %p1208_p8 = scmp.ne.s32.totalorder %s199_s24, %s1207_s26  ;;  %p1215_p11 = scmp.lt.s32.totalorder %s199_s24, %s199_s24 }
   0x7   : > { %p1166_p5 = pneg %p1317_p3  ;;  %p1216_p12 = scmp.lt.s32.totalorder %s1207_s26, %s1207_s26 }
   0x9   : > { %p1167_p6 = pnand %p1170_p4, %p1166_p5  ;;  %p1217_p13 = por %p1216_p12, %p1215_p11 }
   0xb   : > { %p1198_p7 = pneg %p1167_p6 }
   0xd   : > { %p1210_p9 = pnand %p1208_p8, %p1198_p7 }
   0xf   : > { %p1211_p10 = pneg %p1210_p9 }
  0x11   : > { %p1218_p2 = pnand %p1217_p13, %p1211_p10 }
  0x13   : > { %1221 = shalt.err (!%p1218_p2)
}
  0x14   : > { %s1263_s27 = smov 128   ;;  %s1264_s28 = smov 8  }
  0x15   : > { %1169 = dma.hbm_to_vmem [thread:$0]  (!%p1167_p6), %s1527_s4, 4096, %s199_s24, [#allocation5], %s1263_s27, %s1263_s27, %s1264_s28  }
  0x16   : > { %235 = sbr.rel (%p1317_p3) target bundleno = 854 (0x356), region = 44 }
  0x1b   : > { %1251 = dma.done.wait (%p1170_p4), [#allocation5], 4096  }
  0x1c   : > { %1253 = vsyncadd (%p1170_p4), [#allocation5], 4294963200  ;;  %s1069_s7 = sshll.u32 %s1312_s22, 2  ;;  %p1531_p1 = scmp.ne.s32.totalorder %s1312_s22, 0 }
  0x1d   : > { %p266_p0 = scmp.lt.s32.totalorder %s1069_s7, 7 }
  0x1e   : > { %280 = sbr.rel (%p1531_p1) target bundleno = 37 (0x25), region = 52 }
  0x1f   : > { %s1533_s7 = smov (!%p266_p0, %s1069_s7), 7 }
  0x20   : > { %s1070_s8 = sshll.u32 %s1533_s7, 3 }
  0x21   : > { %s269_s11 = scalar_lea.vmem %s1523_s0, %s1070_s8  ;;  %s1342_s14 = scalar_lea.vmem %s1524_s1, %s1070_s8 }
  0x23   : > { %v1265_v0 = vmov 0.0  }
  0x24   : > { %281 = vst [vmem:[#allocation2] sm:$0xff] %v1265_v0  ;;  %282 = vst [vmem:[#allocation3] sm:$0xff] %v1265_v0 }
  0x25 PF: > { %v288_v1 = vld [vmem:[%s1525_s2 + $0x8] sm:$0x3]  ;;  %vm309_vm0 = vcmask 1041408   ;;  %v1349_v2 = vld [vmem:[%s269_s11 + $0x10] sm:$0xff]  ;;  %v1351_v3 = vld [vmem:[%s269_s11] sm:$0xff]  ;;  %v1266_v4 = vmov 0   ;;  %v406_v39 = vlaneseq }
  0x26   : > { %1192 = vset.pattern.permute.xlu1 %v1266_v4  ;;  %1191 = vset.pattern.permute.xlu0 %v1266_v4  ;;  %v287_v5 = vld [vmem:[%s1525_s2] sm:$0xff]  ;;  %vm296_vm1 = vcmask 80896   ;;  %v284_v7 = vld [vmem:[%s1342_s14 + $0x8] sm:$0xff]  ;;  %v1364_v8 = vld [vmem:[%s269_s11 + $0x18] sm:$0xff]  ;;  %vm542_vm2 = vcmp.eq.s32.totalorder %v1351_v3, 0  ;;  %vm544_vm4 = vcmp.eq.s32.totalorder %v1349_v2, 0 }
  0x27   : > { %v283_v6 = vld [vmem:[%s1342_s14] sm:$0xff]  ;;  %1137 = vmatprep.subr.msk.mxu0 %vm309_vm0, %v288_v1  ;;  %415 = vperm.xlu1 %1192, %v1349_v2   ;;  %v1367_v9 = vld [vmem:[%s269_s11 + $0x8] sm:$0xff]  ;;  %v285_v10 = vld [vmem:[%s1342_s14 + $0x10] sm:$0xff]  ;;  %v546_v12 = vsel %vm542_vm2, 1, %v1266_v4  ;;  %v548_v14 = vsel %vm544_vm4, 1, %v1266_v4  ;;  %vm545_vm5 = vcmp.eq.s32.totalorder %v1364_v8, 0 }
  0x28   : > { %409 = vperm.xlu0 %1191, %v1351_v3   ;;  %1138 = vmatpush3.msk.msra.mxu0 %vm309_vm0, %v288_v1  ;;  %v286_v11 = vld [vmem:[%s1342_s14 + $0x18] sm:$0xff]  ;;  %vm543_vm3 = vcmp.eq.s32.totalorder %v1367_v9, 0  ;;  %v1267_v15 = vmov 0.0   ;;  %v549_v16 = vsel %vm545_vm5, 1, %v1266_v4  ;;  %vm581_vm6 = vcmp.eq.s32.totalorder %v1351_v3, 1  ;;  %p1085_p2 = scmp.ne.s32.totalorder %s1312_s22, 1 }
  0x29   : > { %1139 = vmatprep.subr.mxu0 %v287_v5  ;;  %1141 = vmatprep.mubr.msk.f32.mxu0 %vm296_vm1, %v283_v6  ;;  %v547_v13 = vsel %vm543_vm3, 1, %v1266_v4  ;;  %v585_v17 = vsel %vm581_vm6, 1, %v1266_v4  ;;  %vm582_vm7 = vcmp.eq.s32.totalorder %v1367_v9, 1  ;;  %vm583_vm8 = vcmp.eq.s32.totalorder %v1349_v2, 1  ;;  %v1074_v60 = vld [vmem:[%s1526_s3] ss:$0 sm:$0xff] }
  0x2a   : > { %1140 = vmatpush3.msra.mxu0 %v287_v5  ;;  %1147 = vmatprep.subr.mxu1 %v1267_v15  ;;  %v586_v18 = vsel %vm582_vm7, 1, %v1266_v4  ;;  %v587_v19 = vsel %vm583_vm8, 1, %v1266_v4  ;;  %vm584_vm9 = vcmp.eq.s32.totalorder %v1364_v8, 1  ;;  %vm620_vm10 = vcmp.eq.s32.totalorder %v1351_v3, 2 }
  0x2b   : > { %1142 = vmatmul.mubr.msk.f32.vlgmr.msra.gmra.mxu0 %vm296_vm1, %v284_v7  ;;  %418 = vperm.xlu1 %1192, %v1364_v8   ;;  %v588_v20 = vsel %vm584_vm9, 1, %v1266_v4  ;;  %v624_v21 = vsel %vm620_vm10, 1, %v1266_v4  ;;  %vm621_vm11 = vcmp.eq.s32.totalorder %v1367_v9, 2  ;;  %vm622_vm12 = vcmp.eq.s32.totalorder %v1349_v2, 2 }
  0x2c   : > { %412 = vperm.xlu0 %1191, %v1367_v9   ;;  %1144 = vmatprep.mubr.msk.f32.mxu0 %vm296_vm1, %v285_v10  ;;  %v625_v22 = vsel %vm621_vm11, 1, %v1266_v4  ;;  %v626_v23 = vsel %vm622_vm12, 1, %v1266_v4  ;;  %vm659_vm13 = vcmp.eq.s32.totalorder %v1351_v3, 3  ;;  %vm660_vm14 = vcmp.eq.s32.totalorder %v1367_v9, 3 }
  0x2d   : > { %v663_v24 = vsel %vm659_vm13, 1, %v1266_v4  ;;  %v664_v25 = vsel %vm660_vm14, 1, %v1266_v4  ;;  %vm661_vm15 = vcmp.eq.s32.totalorder %v1349_v2, 3  ;;  %vm698_vm2 = vcmp.eq.s32.totalorder %v1351_v3, 4 }
  0x2e   : > { %v665_v26 = vsel %vm661_vm15, 1, %v1266_v4  ;;  %v702_v28 = vsel %vm698_vm2, 1, %v1266_v4  ;;  %vm699_vm3 = vcmp.eq.s32.totalorder %v1367_v9, 4  ;;  %vm700_vm4 = vcmp.eq.s32.totalorder %v1349_v2, 4 }
  0x2f   : > { %1145 = vmatmul.mubr.msk.f32.gmra.mxu0 %vm296_vm1, %v286_v11  ;;  %551 = vperm.xlu1 %1192, %v546_v12   ;;  %vm662_vm1 = vcmp.eq.s32.totalorder %v1364_v8, 3  ;;  %v703_v29 = vsel %vm699_vm3, 1, %v1266_v4  ;;  %v704_v30 = vsel %vm700_vm4, 1, %v1266_v4  ;;  %vm701_vm5 = vcmp.eq.s32.totalorder %v1364_v8, 4 }
  0x30   : > { %v666_v27 = vsel %vm662_vm1, 1, %v1266_v4  ;;  %v705_v31 = vsel %vm701_vm5, 1, %v1266_v4  ;;  %vm737_vm6 = vcmp.eq.s32.totalorder %v1351_v3, 5  ;;  %vm738_vm7 = vcmp.eq.s32.totalorder %v1367_v9, 5 }
  0x31   : > { %v741_v32 = vsel %vm737_vm6, 1, %v1266_v4  ;;  %v742_v33 = vsel %vm738_vm7, 1, %v1266_v4  ;;  %vm740_vm8 = vcmp.eq.s32.totalorder %v1364_v8, 5  ;;  %vm777_vm9 = vcmp.eq.s32.totalorder %v1367_v9, 6 }
  0x32   : > { %v744_v34 = vsel %vm740_vm8, 1, %v1266_v4  ;;  %v781_v35 = vsel %vm777_vm9, 1, %v1266_v4  ;;  %vm779_vm10 = vcmp.eq.s32.totalorder %v1364_v8, 6  ;;  %vm816_vm11 = vcmp.eq.s32.totalorder %v1367_v9, 7 }
  0x33   : > { %554 = vperm.xlu1 %1192, %v547_v13   ;;  %v783_v36 = vsel %vm779_vm10, 1, %v1266_v4  ;;  %v820_v37 = vsel %vm816_vm11, 1, %v1266_v4  ;;  %vm818_vm12 = vcmp.eq.s32.totalorder %v1364_v8, 7  ;;  %vm1268_vm13 = vmmov 0  }
  0x34   : > { %v822_v38 = vsel %vm818_vm12, 1, %v1266_v4  ;;  %1155 = vmatprep.mubr.msk.f32.mxu1 %vm1268_vm13, %v1267_v15  ;;  %v407_v40 = vand.u32 127, %v406_v39  ;;  %vm623_vm3 = vcmp.eq.s32.totalorder %v1364_v8, 2  ;;  %vm739_vm4 = vcmp.eq.s32.totalorder %v1349_v2, 5 }
  0x35   : > { %v627_v52 = vsel %vm623_vm3, 1, %v1266_v4  ;;  %v743_v54 = vsel %vm739_vm4, 1, %v1266_v4  ;;  %vm776_vm5 = vcmp.eq.s32.totalorder %v1351_v3, 6  ;;  %vm778_vm6 = vcmp.eq.s32.totalorder %v1349_v2, 6 }
  0x36   : > { %v780_v56 = vsel %vm776_vm5, 1, %v1266_v4  ;;  %v782_v57 = vsel %vm778_vm6, 1, %v1266_v4  ;;  %vm815_vm7 = vcmp.eq.s32.totalorder %v1351_v3, 7  ;;  %vm817_vm8 = vcmp.eq.s32.totalorder %v1349_v2, 7 }
  0x37   : > { %557 = vperm.xlu1 %1192, %v548_v14   ;;  %v819_v59 = vsel %vm815_vm7, 1, %v1266_v4  ;;  %v821_v0 = vsel %vm817_vm8, 1, %v1266_v4  ;;  %vm465_vm3 = vcmask 261120  }
  0x3b   : > { %560 = vperm.xlu1 %1192, %v549_v16  }
  0x3f   : > { %590 = vperm.xlu1 %1192, %v585_v17  }
  0x43   : > { %593 = vperm.xlu1 %1192, %v586_v18  }
  0x47   : > { %596 = vperm.xlu1 %1192, %v587_v19  }
  0x4b   : > { %599 = vperm.xlu1 %1192, %v588_v20  }
  0x4f   : > { %629 = vperm.xlu1 %1192, %v624_v21  }
  0x53   : > { %632 = vperm.xlu1 %1192, %v625_v22  }
  0x57   : > { %635 = vperm.xlu1 %1192, %v626_v23  }
  0x5b   : > { %668 = vperm.xlu1 %1192, %v663_v24  }
  0x5f   : > { %671 = vperm.xlu1 %1192, %v664_v25  }
  0x63   : > { %674 = vperm.xlu1 %1192, %v665_v26  }
  0x67   : > { %677 = vperm.xlu1 %1192, %v666_v27  }
  0x6b   : > { %707 = vperm.xlu1 %1192, %v702_v28  }
  0x6f   : > { %710 = vperm.xlu1 %1192, %v703_v29  }
  0x73   : > { %713 = vperm.xlu1 %1192, %v704_v30  }
  0x77   : > { %716 = vperm.xlu1 %1192, %v705_v31  }
  0x7b   : > { %746 = vperm.xlu1 %1192, %v741_v32  }
  0x7f   : > { %749 = vperm.xlu1 %1192, %v742_v33  }
  0x83   : > { %755 = vperm.xlu1 %1192, %v744_v34  }
  0x87   : > { %788 = vperm.xlu1 %1192, %v781_v35  }
  0x8b   : > { %794 = vperm.xlu1 %1192, %v783_v36  }
  0x8f   : > { %827 = vperm.xlu1 %1192, %v820_v37  }
  0x93   : > { %833 = vperm.xlu1 %1192, %v822_v38  }
  0xa2   : > { %v416_v43 = vpop.permute.xlu1 %415 }
  0xa3   : > { %v410_v41 = vpop.permute.xlu0 %409  ;;  %vm422_vm15 = vcmp.eq.s32.totalorder %v416_v43, %v407_v40 }
  0xa4   : > { %vm420_vm14 = vcmp.eq.s32.totalorder %v410_v41, %v407_v40  ;;  %v1082_v46 = vsel %vm422_vm15, 1.0, %v1267_v15 }
  0xa5   : > { %v1080_v42 = vsel %vm420_vm14, 1.0, %v1267_v15 }
  0xa6   : > { %433 = vxpose.xlu0.b32.start [1/4] (short) (narrow) %v1080_v42, 8  ;;  %v419_v47 = vpop.permute.xlu1 %418 }
  0xa7   : > { %v413_v44 = vpop.permute.xlu0 %412  ;;  %vm423_vm2 = vcmp.eq.s32.totalorder %v419_v47, %v407_v40 }
  0xa8   : > { %vm421_vm1 = vcmp.eq.s32.totalorder %v413_v44, %v407_v40  ;;  %v1083_v48 = vsel %vm423_vm2, 1.0, %v1267_v15  ;;  %vm852_vm2 = vcmask 1040384  }
  0xa9   : > { %v1081_v45 = vsel %vm421_vm1, 1.0, %v1267_v15 }
  0xaa   : > { %434 = vxpose.xlu0.b32.cont [2/4] (short) (narrow) %v1081_v45, 8  ;;  %v552_v49 = vpop.permute.xlu1 %551 }
  0xab   : > { %vm562_vm11 = vcmp.eq.s32.totalorder %v552_v49, 1 }
  0xae   : > { %435 = vxpose.xlu0.b32.cont [3/4] (short) (narrow) %v1082_v46, 8  ;;  %v555_v50 = vpop.permute.xlu1 %554 }
  0xaf   : > { %vm563_vm9 = vcmp.eq.s32.totalorder %v555_v50, 1 }
  0xb2   : > { %436 = vxpose.xlu0.b32.end [4/4] (short) (narrow) %v1083_v48, 8  ;;  %v558_v51 = vpop.permute.xlu1 %557 }
  0xb3   : > { %vm564_vm13 = vcmp.eq.s32.totalorder %v558_v51, 1 }
  0xb6   : > { %v561_v53 = vpop.permute.xlu1 %560 }
  0xb7   : > { %vm565_vm14 = vcmp.eq.s32.totalorder %v561_v53, 1 }
  0xba   : > { %v591_v55 = vpop.permute.xlu1 %590 }
  0xbb   : > { %vm601_vm12 = vcmp.eq.s32.totalorder %v591_v55, 1 }
  0xbe   : > { %v594_v58 = vpop.permute.xlu1 %593 }
  0xbf   : > { %vm602_vm10 = vcmp.eq.s32.totalorder %v594_v58, 1 }
  0xc2   : > { %v597_v62 = vpop.permute.xlu1 %596 }
  0xc3   : > { %vm603_vm15 = vcmp.eq.s32.totalorder %v597_v62, 1 }
  0xc6   : > { %v600_v11 = vpop.permute.xlu1 %599 }
  0xc7   : > { %vm604_vm1 = vcmp.eq.s32.totalorder %v600_v11, 1 }
  0xca   : > { %v630_v33 = vpop.permute.xlu1 %629 }
  0xce   : > { %v633_v40 = vpop.permute.xlu1 %632 }
  0xd2   : > { %v636_v41 = vpop.permute.xlu1 %635 }
  0xd6   : > { %v669_v42 = vpop.permute.xlu1 %668 }
  0xd7   : > { %vm679_vm8 = vcmp.eq.s32.totalorder %v669_v42, 1 }
  0xda   : > { %v672_v43 = vpop.permute.xlu1 %671 }
  0xdb   : > { %638 = vperm.xlu0 %1191, %v627_v52  }
  0xde   : > { %v675_v44 = vpop.permute.xlu1 %674 }
  0xdf   : > { %752 = vperm.xlu0 %1191, %v743_v54   ;;  %vm681_vm6 = vcmp.eq.s32.totalorder %v675_v44, 1 }
  0xe2   : > { %v678_v46 = vpop.permute.xlu1 %677 }
  0xe3   : > { %785 = vperm.xlu0 %1191, %v780_v56  }
  0xe6   : > { %v708_v47 = vpop.permute.xlu1 %707 }
  0xe7   : > { %791 = vperm.xlu0 %1191, %v782_v57   ;;  %vm718_vm7 = vcmp.eq.s32.totalorder %v708_v47, 1 }
  0xea   : > { %v711_v48 = vpop.permute.xlu1 %710 }
  0xeb   : > { %824 = vperm.xlu0 %1191, %v819_v59   ;;  %v1143_v61 = vpop.f32.mrf.mxu0 }
  0xec   : > { %v385_v63 = vadd.f32 %v1143_v61, %v1074_v60 }
  0xed   : > { %v379_v1 = vpop.f32.mrf.mxu0 }
  0xee   : > { %v1449_v5 = vmax.f32 %v385_v63, 0.0  ;;  %v380_v3 = vadd.f32 %v1074_v60, %v379_v1  ;;  %v714_v49 = vpop.permute.xlu1 %713 }
  0xef   : > { %830 = vperm.xlu0 %1191, %v821_v0   ;;  %v1146_v6 = vpop.f32.mrf.mxu0  ;;  %vm720_vm5 = vcmp.eq.s32.totalorder %v714_v49, 1 }
  0xf0   : > { %v1451_v7 = vmax.f32 %v380_v3, 0.0  ;;  %v395_v8 = vadd.f32 %v1146_v6, %v1074_v60  ;;  %v567_v9 = vsel %vm563_vm9, %v1449_v5, 0.0  ;;  %v606_v10 = vsel %vm602_vm10, %v1449_v5, 0.0 }
  0xf1   : > { %v389_v2 = vpop.f32.mrf.mxu0  ;;  %vm682_vm9 = vcmp.eq.s32.totalorder %v678_v46, 1  ;;  %vm719_vm10 = vcmp.eq.s32.totalorder %v711_v48, 1 }
  0xf2   : > { %v1455_v4 = vmax.f32 %v395_v8, 0.0  ;;  %v390_v12 = vadd.f32 %v1074_v60, %v389_v2  ;;  %v566_v13 = vsel %vm562_vm11, %v1451_v7, 0.0  ;;  %v605_v16 = vsel %vm601_vm12, %v1451_v7, 0.0  ;;  %v717_v50 = vpop.permute.xlu1 %716 }
  0xf3   : > { %v570_v14 = vmax.f32 %v566_v13, %v567_v9  ;;  %v609_v18 = vmax.f32 %v605_v16, %v606_v10  ;;  %vm721_vm4 = vcmp.eq.s32.totalorder %v717_v50, 1  ;;  %v722_v56 = vsel %vm718_vm7, %v1451_v7, 0.0 }
  0xf4   : > { %v1459_v17 = vmax.f32 %v390_v12, 0.0  ;;  %1148 = vmatpush3.msra.mxu1 %v1455_v4  ;;  %v569_v20 = vsel %vm565_vm14, %v1455_v4, 0.0  ;;  %v608_v22 = vsel %vm604_vm1, %v1455_v4, 0.0  ;;  %v725_v53 = vsel %vm721_vm4, %v1455_v4, 0.0 }
  0xf5   : > { %1149 = vmatprep.subr.mxu1 %v1267_v15  ;;  %v683_v58 = vsel %vm679_vm8, %v1451_v7, 0.0  ;;  %v686_v59 = vsel %vm682_vm9, %v1455_v4, 0.0  ;;  %vm680_vm11 = vcmp.eq.s32.totalorder %v672_v43, 1  ;;  %v723_v60 = vsel %vm719_vm10, %v1449_v5, 0.0 }
  0xf6   : > { %1150 = vmatpush3.msra.mxu1 %v1459_v17  ;;  %v568_v19 = vsel %vm564_vm13, %v1459_v17, 0.0  ;;  %v607_v21 = vsel %vm603_vm15, %v1459_v17, 0.0  ;;  %v747_v51 = vpop.permute.xlu1 %746  ;;  %v724_v52 = vsel %vm720_vm5, %v1459_v17, 0.0  ;;  %v685_v55 = vsel %vm681_vm6, %v1459_v17, 0.0 }
  0xf7   : > { %1151 = vmatprep.subr.mxu1 %v1267_v15  ;;  %v571_v23 = vmax.f32 %v568_v19, %v569_v20  ;;  %v610_v24 = vmax.f32 %v607_v21, %v608_v22  ;;  %v727_v57 = vmax.f32 %v724_v52, %v725_v53  ;;  %v688_v61 = vmax.f32 %v685_v55, %v686_v59 }
  0xf8   : > { %1152 = vmatpush3.msra.mxu1 %v1449_v5  ;;  %v726_v62 = vmax.f32 %v722_v56, %v723_v60  ;;  %v684_v63 = vsel %vm680_vm11, %v1449_v5, 0.0  ;;  %vm640_vm12 = vcmp.eq.s32.totalorder %v630_v33, 1  ;;  %vm641_vm13 = vcmp.eq.s32.totalorder %v633_v40, 1 }
  0xf9   : > { %1153 = vmatprep.subr.mxu1 %v1267_v15  ;;  %v572_v25 = vmax.f32 %v570_v14, %v571_v23  ;;  %v611_v26 = vmax.f32 %v609_v18, %v610_v24  ;;  %v687_v1 = vmax.f32 %v683_v58, %v684_v63  ;;  %v644_v11 = vsel %vm640_vm12, %v1451_v7, 0.0 }
  0xfa   : > { %1154 = vmatpush3.msra.mxu1 %v1451_v7  ;;  %v750_v54 = vpop.permute.xlu1 %749  ;;  %v728_v3 = vmax.f32 %v726_v62, %v727_v57  ;;  %vm642_vm14 = vcmp.eq.s32.totalorder %v636_v41, 1  ;;  %v645_v13 = vsel %vm641_vm13, %v1449_v5, 0.0  ;;  %vm855_vm9 = vcmask 1042432  }
  0xfb   : > { %v573_v27 = vrot.slane %v572_v25, 4  ;;  %v612_v28 = vrot.slane %v611_v26, 4  ;;  %v689_v6 = vmax.f32 %v687_v1, %v688_v61  ;;  %vm758_vm15 = vcmp.eq.s32.totalorder %v750_v54, 1 }
  0xfc   : > { %v729_v8 = vrot.slane %v728_v3, 4  ;;  %v646_v14 = vsel %vm642_vm14, %v1459_v17, 0.0  ;;  %v648_v19 = vmax.f32 %v644_v11, %v645_v13  ;;  %v762_v21 = vsel %vm758_vm15, %v1449_v5, 0.0 }
  0xfd   : > { %v574_v29 = vmax.f32 %v572_v25, %v573_v27  ;;  %v613_v30 = vmax.f32 %v611_v26, %v612_v28  ;;  %v690_v2 = vrot.slane %v689_v6, 4  ;;  %vm857_vm12 = vcmask 1043456  }
  0xfe   : > { %v756_v0 = vpop.permute.xlu1 %755  ;;  %v730_v12 = vmax.f32 %v728_v3, %v729_v8  ;;  %vm859_vm14 = vcmask 1044480  }
  0xff   : > { %v575_v31 = vrot.slane %v574_v29, 2  ;;  %v614_v32 = vrot.slane %v613_v30, 2  ;;  %v691_v18 = vmax.f32 %v689_v6, %v690_v2 }
 0x100   : > { %v731_v24 = vrot.slane %v730_v12, 2 }
 0x101   : > { %v576_v34 = vmax.f32 %v574_v29, %v575_v31  ;;  %v615_v35 = vmax.f32 %v613_v30, %v614_v32  ;;  %v692_v28 = vrot.slane %v691_v18, 2 }
 0x102   : > { %v789_v9 = vpop.permute.xlu1 %788 }
 0x103   : > { %v577_v36 = vrot.slane %v576_v34, 1  ;;  %v616_v37 = vrot.slane %v615_v35, 1  ;;  %vm797_vm6 = vcmp.eq.s32.totalorder %v789_v9, 1 }
 0x104   : > { %v801_v46 = vsel %vm797_vm6, %v1449_v5, 0.0 }
 0x105   : > { %v578_v38 = vmax.f32 %v576_v34, %v577_v36  ;;  %v617_v39 = vmax.f32 %v615_v35, %v616_v37  ;;  %v732_v34 = vmax.f32 %v730_v12, %v731_v24 }
 0x106   : > { %v795_v22 = vpop.permute.xlu1 %794 }
 0x107   : > { %v1472_v15 = vsel %vm852_vm2, %v578_v38, %v617_v39  ;;  %vm757_vm2 = vcmp.eq.s32.totalorder %v747_v51, 1  ;;  %v693_v38 = vmax.f32 %v691_v18, %v692_v28  ;;  %vm799_vm7 = vcmp.eq.s32.totalorder %v795_v22, 1 }
 0x108   : > { %v761_v26 = vsel %vm757_vm2, %v1451_v7, 0.0  ;;  %v733_v43 = vrot.slane %v732_v34, 1  ;;  %v803_v47 = vsel %vm799_vm7, %v1455_v4, 0.0 }
 0x109   : > { %v765_v30 = vmax.f32 %v761_v26, %v762_v21  ;;  %v694_v48 = vrot.slane %v693_v38, 1 }
 0x10a   : > { %v828_v37 = vpop.permute.xlu1 %827  ;;  %v734_v59 = vmax.f32 %v732_v34, %v733_v43 }
 0x10b   : > { %vm836_vm11 = vcmp.eq.s32.totalorder %v828_v37, 1  ;;  %v695_v60 = vmax.f32 %v693_v38, %v694_v48 }
 0x10c   : > { %v840_v2 = vsel %vm836_vm11, %v1449_v5, 0.0  ;;  %v865_v5 = vld [vmem:[#allocation2] sm:$0xff] }
 0x10e   : > { %v834_v54 = vpop.permute.xlu1 %833 }
 0x10f   : > { %vm838_vm13 = vcmp.eq.s32.totalorder %v834_v54, 1 }
 0x122   : > { %v449_v45 = vpop.trf.xlu0 }
 0x123   : > { %1156 = vmatmul.mubr.msk.f32.vlgmr.msra.gmra.mxu1 %vm465_vm3, %v449_v45  ;;  %vm760_vm3 = vcmp.eq.s32.totalorder %v756_v0, 1 }
 0x124   : > { %v764_v27 = vsel %vm760_vm3, %v1455_v4, 0.0 }
 0x156   : > { %v639_v10 = vpop.permute.xlu0 %638 }
 0x157   : > { %vm643_vm1 = vcmp.eq.s32.totalorder %v639_v10, 1  ;;  %v842_v10 = vsel %vm838_vm13, %v1455_v4, 0.0 }
 0x158   : > { %v647_v16 = vsel %vm643_vm1, %v1455_v4, 0.0  ;;  %vm863_vm1 = vcmask 1046528  }
 0x159   : > { %v649_v20 = vmax.f32 %v646_v14, %v647_v16 }
 0x15a   : > { %v753_v23 = vpop.permute.xlu0 %752 }
 0x15b   : > { %v650_v25 = vmax.f32 %v648_v19, %v649_v20  ;;  %vm759_vm4 = vcmp.eq.s32.totalorder %v753_v23, 1 }
 0x15c   : > { %v763_v29 = vsel %vm759_vm4, %v1459_v17, 0.0 }
 0x15d   : > { %v651_v31 = vrot.slane %v650_v25, 4  ;;  %v766_v32 = vmax.f32 %v763_v29, %v764_v27  ;;  %v432_v27 = vld [vmem:[#allocation3] sm:$0xff] }
 0x15e   : > { %v786_v33 = vpop.permute.xlu0 %785 }
 0x15f   : > { %v652_v35 = vmax.f32 %v650_v25, %v651_v31  ;;  %v767_v36 = vmax.f32 %v765_v30, %v766_v32  ;;  %vm796_vm5 = vcmp.eq.s32.totalorder %v786_v33, 1 }
 0x160   : > { %v800_v41 = vsel %vm796_vm5, %v1451_v7, 0.0 }
 0x161   : > { %v653_v39 = vrot.slane %v652_v35, 2  ;;  %v768_v40 = vrot.slane %v767_v36, 4  ;;  %v804_v52 = vmax.f32 %v800_v41, %v801_v46 }
 0x162   : > { %v792_v42 = vpop.permute.xlu0 %791 }
 0x163   : > { %v654_v44 = vmax.f32 %v652_v35, %v653_v39  ;;  %v769_v45 = vmax.f32 %v767_v36, %v768_v40  ;;  %vm798_vm8 = vcmp.eq.s32.totalorder %v792_v42, 1 }
 0x164   : > { %v802_v49 = vsel %vm798_vm8, %v1459_v17, 0.0 }
 0x165   : > { %v655_v50 = vrot.slane %v654_v44, 1  ;;  %v770_v51 = vrot.slane %v769_v45, 2  ;;  %v805_v53 = vmax.f32 %v802_v49, %v803_v47 }
 0x166   : > { %v825_v55 = vpop.permute.xlu0 %824 }
 0x167   : > { %v656_v56 = vmax.f32 %v654_v44, %v655_v50  ;;  %v771_v57 = vmax.f32 %v769_v45, %v770_v51  ;;  %v806_v58 = vmax.f32 %v804_v52, %v805_v53  ;;  %vm835_vm10 = vcmp.eq.s32.totalorder %v825_v55, 1 }
 0x168   : > { %v839_v1 = vsel %vm835_vm10, %v1451_v7, 0.0 }
 0x169   : > { %v854_v61 = vsel %vm309_vm0, %v1472_v15, %v656_v56  ;;  %v772_v62 = vrot.slane %v771_v57, 1  ;;  %v807_v63 = vrot.slane %v806_v58, 4  ;;  %v843_v15 = vmax.f32 %v839_v1, %v840_v2 }
 0x16a   : > { %v856_v0 = vsel %vm855_vm9, %v854_v61, %v695_v60  ;;  %v831_v3 = vpop.permute.xlu0 %830  ;;  %vm861_vm0 = vcmask 1045504  }
 0x16b   : > { %v773_v6 = vmax.f32 %v771_v57, %v772_v62  ;;  %v858_v8 = vsel %vm857_vm12, %v856_v0, %v734_v59  ;;  %v808_v9 = vmax.f32 %v806_v58, %v807_v63  ;;  %vm837_vm15 = vcmp.eq.s32.totalorder %v831_v3, 1 }
 0x16c   : > { %v841_v11 = vsel %vm837_vm15, %v1459_v17, 0.0 }
 0x16d   : > { %v860_v12 = vsel %vm859_vm14, %v858_v8, %v773_v6  ;;  %v809_v13 = vrot.slane %v808_v9, 2  ;;  %v844_v14 = vmax.f32 %v841_v11, %v842_v10 }
 0x16f   : > { %v810_v16 = vmax.f32 %v808_v9, %v809_v13  ;;  %v845_v18 = vmax.f32 %v843_v15, %v844_v14 }
 0x171   : > { %v811_v19 = vrot.slane %v810_v16, 1  ;;  %v846_v20 = vrot.slane %v845_v18, 4 }
 0x173   : > { %v812_v7 = vmax.f32 %v810_v16, %v811_v19  ;;  %v847_v21 = vmax.f32 %v845_v18, %v846_v20 }
 0x175   : > { %v862_v22 = vsel %vm861_vm0, %v860_v12, %v812_v7  ;;  %v848_v23 = vrot.slane %v847_v21, 2 }
 0x177   : > { %v849_v24 = vmax.f32 %v847_v21, %v848_v23 }
 0x179   : > { %v850_v25 = vrot.slane %v849_v24, 1 }
 0x17b   : > { %v851_v4 = vmax.f32 %v849_v24, %v850_v25 }
 0x17d   : > { %v864_v26 = vsel %vm863_vm1, %v862_v22, %v851_v4 }
 0x17e   : > { %v866_v17 = vmax.f32 %v865_v5, %v864_v26 }
 0x180   : > { %867 = vst [vmem:[#allocation2] sm:$0xff] %v866_v17 }
 0x1e2   : > { %871 = sbr.rel (%p1085_p2) target bundleno = 839 (0x347), region = 56 }
 0x1e3   : > { %v535_v28 = vpop.f32.mrf.mxu1 }
 0x1e4   : > { %v539_v29 = vadd.f32 %v535_v28, %v432_v27 }
 0x1e5   : > { %v1157_v30 = vpop.f32.mrf.mxu1 }
 0x1e6   : > { %540 = vst [vmem:[#allocation3] sm:$0xff] %v539_v29 }
 0x1e7   : > { %v913_v32 = vld [vmem:[#allocation4 + $0xf8] sm:$0xff]  ;;  %v1269_v34 = vmov 32   ;;  %v912_v36 = vld [vmem:[#allocation4 + $0xf0] sm:$0xff]  ;;  %v911_v38 = vld [vmem:[#allocation4 + $0xe8] sm:$0xff] }
 0x1e8   : > { %v897_v33 = vld [vmem:[#allocation4 + $0x78] sm:$0xff]  ;;  %1193 = vset.pattern.permute.xlu0 %v1269_v34  ;;  %1102 = vmatprep.subr.mxu0 %v913_v32  ;;  %v896_v37 = vld [vmem:[#allocation4 + $0x70] sm:$0xff]  ;;  %v895_v39 = vld [vmem:[#allocation4 + $0x68] sm:$0xff] }
 0x1e9   : > { %1103 = vmatpush3.msra.mxu0 %v897_v33  ;;  %v910_v40 = vld [vmem:[#allocation4 + $0xe0] sm:$0xff]  ;;  %v909_v42 = vld [vmem:[#allocation4 + $0xd8] sm:$0xff]  ;;  %v908_v44 = vld [vmem:[#allocation4 + $0xd0] sm:$0xff] }
 0x1ea   : > { %1104 = vmatprep.subr.mxu0 %v912_v36  ;;  %v894_v41 = vld [vmem:[#allocation4 + $0x60] sm:$0xff]  ;;  %v893_v43 = vld [vmem:[#allocation4 + $0x58] sm:$0xff]  ;;  %v892_v45 = vld [vmem:[#allocation4 + $0x50] sm:$0xff] }
 0x1eb   : > { %1105 = vmatpush3.msra.mxu0 %v896_v37  ;;  %v907_v46 = vld [vmem:[#allocation4 + $0xc8] sm:$0xff]  ;;  %v906_v48 = vld [vmem:[#allocation4 + $0xc0] sm:$0xff]  ;;  %v905_v50 = vld [vmem:[#allocation4 + $0xb8] sm:$0xff] }
 0x1ec   : > { %1106 = vmatprep.subr.mxu0 %v911_v38  ;;  %v891_v47 = vld [vmem:[#allocation4 + $0x48] sm:$0xff]  ;;  %v890_v49 = vld [vmem:[#allocation4 + $0x40] sm:$0xff]  ;;  %v889_v51 = vld [vmem:[#allocation4 + $0x38] sm:$0xff] }
 0x1ed   : > { %v1501_v31 = vld [vmem:[#allocation3] sm:$0xff]  ;;  %1107 = vmatpush3.msra.mxu0 %v895_v39  ;;  %v904_v53 = vld [vmem:[#allocation4 + $0xb0] sm:$0xff]  ;;  %v903_v55 = vld [vmem:[#allocation4 + $0xa8] sm:$0xff] }
 0x1ee   : > { %v873_v35 = vmax.f32 %v1501_v31, 1.0  ;;  %1108 = vmatprep.subr.mxu0 %v910_v40  ;;  %v888_v54 = vld [vmem:[#allocation4 + $0x30] sm:$0xff]  ;;  %v887_v56 = vld [vmem:[#allocation4 + $0x28] sm:$0xff]  ;;  %v902_v57 = vld [vmem:[#allocation4 + $0xa0] sm:$0xff] }
 0x1ef   : > { %1109 = vmatpush3.msra.mxu0 %v894_v41  ;;  %v886_v58 = vld [vmem:[#allocation4 + $0x20] sm:$0xff]  ;;  %v901_v59 = vld [vmem:[#allocation4 + $0x98] sm:$0xff]  ;;  %v900_v61 = vld [vmem:[#allocation4 + $0x90] sm:$0xff] }
 0x1f0   : > { %1194 = vrcp.f32 %v873_v35  ;;  %1110 = vmatprep.subr.mxu0 %v909_v42  ;;  %v885_v60 = vld [vmem:[#allocation4 + $0x18] sm:$0xff]  ;;  %v884_v62 = vld [vmem:[#allocation4 + $0x10] sm:$0xff]  ;;  %v899_v63 = vld [vmem:[#allocation4 + $0x88] sm:$0xff] }
 0x1f1   : > { %1111 = vmatpush3.msra.mxu0 %v893_v43  ;;  %v883_v0 = vld [vmem:[#allocation4 + $0x8] sm:$0xff]  ;;  %v898_v1 = vld [vmem:[#allocation4 + $0x80] sm:$0xff]  ;;  %v881_v9 = vld [vmem:[#allocation2] sm:$0xff] }
 0x1f2   : > { %1112 = vmatprep.subr.mxu0 %v908_v44  ;;  %v882_v3 = vld [vmem:[#allocation4] sm:$0xff]  ;;  %v1086_v10 = vld [vmem:[%s1528_s5] ss:$0 sm:$0xff] }
 0x1f3   : > { %1113 = vmatpush3.msra.mxu0 %v892_v45 }
 0x1f4   : > { %1114 = vmatprep.subr.mxu0 %v907_v46 }
 0x1f5   : > { %1115 = vmatpush3.msra.mxu0 %v891_v47 }
 0x1f6   : > { %1116 = vmatprep.subr.mxu0 %v906_v48 }
 0x1f7   : > { %1117 = vmatpush3.msra.mxu0 %v890_v49 }
 0x1f8   : > { %1118 = vmatprep.subr.mxu0 %v905_v50 }
 0x1f9   : > { %1119 = vmatpush3.msra.mxu0 %v889_v51 }
 0x1fa   : > { %1120 = vmatprep.subr.mxu0 %v904_v53 }
 0x1fb   : > { %1121 = vmatpush3.msra.mxu0 %v888_v54 }
 0x1fc   : > { %1122 = vmatprep.subr.mxu0 %v903_v55 }
 0x1fd   : > { %v1195_v52 = vpop.eup %1194  ;;  %1123 = vmatpush3.msra.mxu0 %v887_v56 }
 0x1fe   : > { %877 = vperm.xlu0 %1193, %v1195_v52   ;;  %1124 = vmatprep.subr.mxu0 %v902_v57 }
 0x1ff   : > { %1125 = vmatpush3.msra.mxu0 %v886_v58 }
 0x200   : > { %1126 = vmatprep.subr.mxu0 %v901_v59 }
 0x201   : > { %1127 = vmatpush3.msra.mxu0 %v885_v60 }
 0x202   : > { %1128 = vmatprep.subr.mxu0 %v900_v61 }
 0x203   : > { %1129 = vmatpush3.msra.mxu0 %v884_v62 }
 0x204   : > { %1130 = vmatprep.subr.mxu0 %v899_v63 }
 0x205   : > { %1131 = vmatpush3.msra.mxu0 %v883_v0 }
 0x206   : > { %1132 = vmatprep.subr.mxu0 %v898_v1 }
 0x207   : > { %1133 = vmatpush3.msra.mxu0 %v882_v3 }
 0x279   : > { %v878_v6 = vpop.permute.xlu0 %877 }
 0x27a   : > { %v880_v8 = vmul.f32 %v878_v6, %v1501_v31 }
 0x27c   : > { %985 = vmatprep.mubr.f32.mxu0 %v880_v8 }
 0x27d   : > { %986 = vmatmul.mubr.f32.vlgmr.msra.gmra.mxu0 %v881_v9 }
 0x33d   : > { %v1134_v2 = vpop.f32.mrf.mxu0 }
 0x33f   : > { %v1135_v11 = vpop.f32.mrf.mxu0 }
 0x340   : > { %v1136_v12 = vadd.f32 %v1135_v11, %v1134_v2 }
 0x342   : > { %v988_v13 = vadd.f32 %v1136_v12, %v1086_v10 }
 0x344   : > { %v991_v15 = vmax.f32 %v988_v13, 0.0 }
 0x346   : > { %992 = vst [vmem:[#allocation7] sm:$0xff] %v991_v15 }
 0x347 PF: > { %p1172_p3 = scmp.eq.s32.totalorder %s1312_s22, 1  ;;  %s1270_s25 = smov [#allocation7]  }
 0x348   : > { %s1000_s26 = sshll.u32 %s1270_s25, 4  ;;  %s1001_s26 = int_to_ptr.vmem [resolvable:$true] %s1000_s26 }
 0x349   : > { %s1222_s27 = scalar_lea.vmem %s1001_s26, 128  ;;  %p1229_p7 = scmp.lt.s32.totalorder %s1001_s26, %s1001_s26 }
 0x34a   : > { %p1223_p4 = scmp.ne.s32.totalorder %s1001_s26, %s1222_s27  ;;  %p1230_p8 = scmp.lt.s32.totalorder %s1222_s27, %s1222_s27 }
 0x34c   : > { %p1224_p5 = pnand %p1223_p4, %p1172_p3  ;;  %p1231_p9 = por %p1230_p8, %p1229_p7 }
 0x34e   : > { %p1225_p6 = pneg %p1224_p5 }
 0x350   : > { %p1232_p10 = pnand %p1231_p9, %p1225_p6 }
 0x352   : > { %1235 = shalt.err (!%p1232_p10)
}
 0x353   : > { %1163 = dma.vmem_to_hbm [thread:$0]  (%p1172_p3), %s1001_s26, 128, %s1529_s6, [#allocation6]  }
 0x354   : > { %1255 = dma.done.wait (%p1172_p3), [#allocation6], 128  }
 0x355   : > { %1257 = vsyncadd (%p1172_p3), [#allocation6], 4294967168 }
 0x356 PF: > { %s18_s21 = sadd.s32 1, %s1260_s21  }
 0x357   : > { %p15_p11 = scmp.ge.s32.totalorder %s18_s21, 4  }
 0x359   :  { %17 = sbr.rel (!%p15_p11) target bundleno = 2 (0x2), region = 87 }
 0x35e   :  { %1013 = vsyncpa [#allocation5], 1 }
 0x35f   :  { %1015 = vsyncpa [#allocation5 + $0x1], 1 }
 0x360   :  { %1016 = vsyncpa [#allocation6], 1 }
 0x361   :  { %1018 = vsyncpa [#allocation6 + $0x1], 1 }

</bundles_post_ra>
